<compile_context>
chip_gen: v7x
topology: tpu7x:2x2x1
jax: 0.10.0
libtpu: 0.0.40
codegen_flags: <defaults>
</compile_context>

<pallas_src>
import functools
import math

import jax
import jax.numpy as jnp
from jax.experimental import pallas as pl
from jax.experimental.pallas import tpu as pltpu


def _round_up(a, b):
    return (a + b - 1) // b * b


def _fold_lanes_kernel(x_ref, o_ref, *, k, suffix, use_min):
    """x_ref: (bR, k*suffix) with the k folds contiguous on lanes; o_ref: (bR, suffix)."""
    if suffix == 1:
        # Each row holds exactly one k-tuple: a plain lane reduce.
        v = x_ref[...]
        o_ref[...] = (jnp.min(v, axis=1, keepdims=True) if use_min
                      else jnp.max(v, axis=1, keepdims=True))
        return
    reduce_fn = jnp.minimum if use_min else jnp.maximum
    # suffix is a multiple of 128 on this path -> all slices are lane-aligned.
    parts = [x_ref[:, j * suffix:(j + 1) * suffix] for j in range(k)]
    # Pairwise tree reduce: breaks the serial VPU dependency chain for k >= 4.
    while len(parts) > 1:
        nxt = [reduce_fn(parts[i], parts[i + 1]) for i in range(0, len(parts) - 1, 2)]
        if len(parts) % 2:
            nxt.append(parts[-1])
        parts = nxt
    o_ref[...] = parts[0]


def _fold_sublanes_kernel(x_ref, o_ref, *, use_min):
    """x_ref: (bR, k, bS); o_ref: (bR, bS). The k folds sit on the second-minor axis."""
    v = x_ref[...]
    o_ref[...] = jnp.min(v, axis=1) if use_min else jnp.max(v, axis=1)


def folding_maxout(x, k, dim, use_min=False, *,
                   vmem_budget_bytes=24 << 20,     # double-buffered in+out budget
                   vmem_limit_bytes=32 << 20):     # v5e's scoped default is only 16 MiB
    """Pallas implementation of FoldingMaxout.forward (consecutive k-groups along `dim`)."""
    s = x.shape
    if dim < 0:
        dim += len(s)
    assert 0 <= dim < len(s)
    assert s[dim] % k == 0, "folded dim must be divisible by k"
    out_d = s[dim] // k
    prefix = int(math.prod(s[:dim]))
    suffix = int(math.prod(s[dim + 1:]))
    rows = prefix * out_d
    out_shape_full = s[:dim] + (out_d,) + s[dim + 1:]

    itemsize = jnp.dtype(x.dtype).itemsize
    row_mult = max(8, 32 // itemsize)          # sublane packing: 8 f32 / 16 bf16 / 32 int8

    cost = pl.CostEstimate(
        flops=rows * (k - 1) * suffix,         # one compare/select per input element
        transcendentals=0,
        bytes_accessed=rows * suffix * (k + 1) * itemsize,
    )

    # ---- path selection (all paths are copy-free reshapes of x) -------------
    in_row_vmem = _round_up(k * suffix, 128) * itemsize     # VMEM footprint of one row
    out_row_vmem = _round_up(suffix, 128) * itemsize
    fits_dense = 2 * row_mult * (in_row_vmem + out_row_vmem) <= vmem_budget_bytes
    use_lane_path = (suffix == 1) or (suffix % 128 == 0 and fits_dense)

    if use_lane_path:
        # -------- lane-folded 2-D path: (rows, k*suffix) -> (rows, suffix) ----
        xr = x.reshape(rows, k * suffix)
        per_row = 2 * (in_row_vmem + out_row_vmem)           # double-buffered in+out
        block_rows = max(row_mult,
                         (vmem_budget_bytes // per_row) // row_mult * row_mult)
        if rows > row_mult:                                  # keep >= 2 grid steps
            block_rows = min(block_rows, _round_up(pl.cdiv(rows, 2), row_mult))
        if block_rows >= rows:
            block_rows = rows                                # full-dim block is legal
        grid = (pl.cdiv(rows, block_rows),)

        out_flat = pl.pallas_call(
            functools.partial(_fold_lanes_kernel, k=k, suffix=suffix, use_min=use_min),
            out_shape=jax.ShapeDtypeStruct((rows, suffix), x.dtype),
            grid=grid,
            in_specs=[pl.BlockSpec((block_rows, k * suffix), lambda i: (i, 0))],
            out_specs=pl.BlockSpec((block_rows, suffix), lambda i: (i, 0)),
            compiler_params=pltpu.CompilerParams(
                dimension_semantics=("parallel",),
                vmem_limit_bytes=vmem_limit_bytes),
            cost_estimate=cost,
        )(xr)
    else:
        # -------- sublane-fold 3-D path: (rows, k, suffix) -> (rows, suffix) --
        xr = x.reshape(rows, k, suffix)
        k_pad = _round_up(k, 8)
        s_pad_full = _round_up(suffix, 128)
        fits_full_s = 2 * row_mult * (k_pad + 1) * s_pad_full * itemsize <= vmem_budget_bytes
        if fits_full_s:
            block_s, bs_pad = suffix, s_pad_full
        else:
            bs_pad = max(128, (vmem_budget_bytes
                               // (2 * row_mult * (k_pad + 1) * itemsize)) // 128 * 128)
            if bs_pad >= s_pad_full:
                block_s, bs_pad = suffix, s_pad_full
            else:
                block_s = bs_pad                              # multiple of 128 -> legal
        per_row = 2 * (k_pad + 1) * bs_pad * itemsize
        block_rows = max(row_mult,
                         (vmem_budget_bytes // per_row) // row_mult * row_mult)
        n_s = pl.cdiv(suffix, block_s)
        if n_s == 1 and rows > row_mult:                      # keep >= 2 grid steps
            block_rows = min(block_rows, _round_up(pl.cdiv(rows, 2), row_mult))
        if block_rows >= rows:
            block_rows = rows
        grid = (pl.cdiv(rows, block_rows), n_s)

        out_flat = pl.pallas_call(
            functools.partial(_fold_sublanes_kernel, use_min=use_min),
            out_shape=jax.ShapeDtypeStruct((rows, suffix), x.dtype),
            grid=grid,
            in_specs=[pl.BlockSpec((block_rows, k, block_s), lambda i, j: (i, 0, j))],
            out_specs=pl.BlockSpec((block_rows, block_s), lambda i, j: (i, j)),
            compiler_params=pltpu.CompilerParams(
                dimension_semantics=("parallel", "parallel"),
                vmem_limit_bytes=vmem_limit_bytes),
            cost_estimate=cost,
        )(xr)

    return out_flat.reshape(out_shape_full)


def _reference(x, k, dim, use_min):
    s = x.shape
    d = dim if dim >= 0 else dim + len(s)
    folded = x.reshape(s[:d] + (s[d] // k, k) + s[d + 1:])
    return jnp.min(folded, axis=d + 1) if use_min else jnp.max(folded, axis=d + 1)


if __name__ == "__main__":
    root = jax.random.PRNGKey(0)
    k1, k2, k3, k4, k5 = jax.random.split(root, 5)

    # 1) Conv-style NCHW activation, fold channels (128-aligned suffix -> lane path).
    x1 = jax.random.normal(k1, (2, 4, 16, 16), dtype=jnp.float32)
    y = jax.block_until_ready(folding_maxout(x1, k=2, dim=1))
    assert y.shape == (2, 2, 16, 16)
    assert jnp.allclose(y, _reference(x1, 2, 1, False)), "case1 max mismatch"
    y = jax.block_until_ready(folding_maxout(x1, k=2, dim=1, use_min=True))
    assert jnp.allclose(y, _reference(x1, 2, 1, True)), "case1 min mismatch"

    # 2) Fold the LAST dim (suffix == 1): lane-reduce path, no pad-to-128.
    x2 = jax.random.normal(k2, (2, 8, 6), dtype=jnp.float32)
    y = jax.block_until_ready(folding_maxout(x2, k=2, dim=-1))
    assert y.shape == (2, 8, 3)
    assert jnp.allclose(y, _reference(x2, 2, -1, False)), "case2 max mismatch"
    y = jax.block_until_ready(folding_maxout(x2, k=2, dim=-1, use_min=True))
    assert jnp.allclose(y, _reference(x2, 2, -1, True)), "case2 min mismatch"

    # 3) k = 4: exercises the pairwise tree reduce.
    x3 = jax.random.normal(k3, (2, 8, 16, 16), dtype=jnp.float32)
    y = jax.block_until_ready(folding_maxout(x3, k=4, dim=1))
    assert y.shape == (2, 2, 16, 16)
    assert jnp.allclose(y, _reference(x3, 4, 1, False)), "case3 mismatch"

    # 4) Non-128-aligned suffix (16*20 = 320): sublane-fold path, full-suffix block.
    x4 = jax.random.normal(k4, (2, 4, 16, 20), dtype=jnp.float32)
    y = jax.block_until_ready(folding_maxout(x4, k=2, dim=1))
    assert y.shape == (2, 2, 16, 20)
    assert jnp.allclose(y, _reference(x4, 2, 1, False)), "case4 mismatch"

    # 5) Force the suffix-tiled 2-D grid path with a small VMEM budget.
    y = jax.block_until_ready(
        folding_maxout(x1, k=2, dim=1, vmem_budget_bytes=32 * 1024))
    assert jnp.allclose(y, _reference(x1, 2, 1, False)), "case5 mismatch"

    # 6) bf16: dtype-aware sublane rounding (row blocks multiple of 16).
    x5 = jax.random.normal(k5, (2, 4, 8, 16), dtype=jnp.bfloat16)
    y = jax.block_until_ready(folding_maxout(x5, k=2, dim=1))
    assert y.shape == (2, 2, 8, 16)
    assert jnp.allclose(y.astype(jnp.float32),
                        _reference(x5, 2, 1, False).astype(jnp.float32)), "case6 mismatch"

    print("KERNEL_OK")
</pallas_src>

<mosaic_0001>
module attributes {stable_mosaic.version = 11 : i64} {
  func.func @_fold_lanes_kernel(%arg0: i32, %arg1: memref<4x512xf32, #tpu.memory_space<vmem>>, %arg2: memref<4x256xf32, #tpu.memory_space<vmem>>) attributes {dimension_semantics = [#tpu.dimension_semantics<parallel>], iteration_bounds = array<i64: 1>, scalar_prefetch = 0 : i64, scratch_operands = 0 : i64, tpu.core_type = #tpu.core_type<tc>, window_params = [{transform_indices = @transform_0, window_bounds = array<i64: 4, 512>}, {transform_indices = @transform_1, window_bounds = array<i64: 4, 256>}]} {
    %c0 = arith.constant 0 : index
    %c0_0 = arith.constant 0 : index
    %0 = vector.load %arg1[%c0, %c0_0] : memref<4x512xf32, #tpu.memory_space<vmem>>, vector<4x256xf32>
    %c0_1 = arith.constant 0 : index
    %c256 = arith.constant 256 : index
    %1 = vector.load %arg1[%c0_1, %c256] : memref<4x512xf32, #tpu.memory_space<vmem>>, vector<4x256xf32>
    %2 = arith.maximumf %0, %1 : vector<4x256xf32>
    %c0_2 = arith.constant 0 : index
    %c0_3 = arith.constant 0 : index
    %3 = vector.load %arg2[%c0_2, %c0_3] : memref<4x256xf32, #tpu.memory_space<vmem>>, vector<4x256xf32>
    tpu.vector_store %arg2[%c0_2, %c0_3], %2 {strides = array<i32>} : memref<4x256xf32, #tpu.memory_space<vmem>>, vector<4x256xf32>,
    return
  }
  func.func @transform_0(%arg0: i32) -> (i32, i32) {
    %c0_i32 = arith.constant 0 : i32
    %c0_i32_0 = arith.constant 0 : i32
    return %arg0, %c0_i32 : i32, i32
  }
  func.func @transform_1(%arg0: i32) -> (i32, i32) {
    %c0_i32 = arith.constant 0 : i32
    %c0_i32_0 = arith.constant 0 : i32
    return %arg0, %c0_i32 : i32, i32
  }
}

</mosaic_0001>

<bundles_post_ra>
// kernel: tpu_custom_call.1
= control target key start
LH: loop header
LB: loop body
LE: loop exit
PB: predicated region body
PF: predicated region fallthrough
CT: control target
= control target key end

     0   :  { %6 = vsyncpa [#allocation3], 0  ;;  %s126_s0 = inlined_call_operand.hbm [shape: f32[4,512], index: 0, kind: input, shape index: {}]   ;;  %s127_s1 = inlined_call_operand.hbm [shape: f32[4,256], index: 1, kind: output, shape index: {}]  }
   0x1   :  { %7 = vsyncpa [#allocation4], 0  ;;  %s90_s6 = smov [#allocation2]   ;;  %s42_s10 = scalar_lea.hbm %s126_s0, 256 }
   0x2   :  { %s14_s7 = sshll.u32 %s90_s6, 4  ;;  %p43_p0 = scmp.ne.s32.totalorder %s126_s0, %s42_s10  ;;  %s15_s7 = int_to_ptr.vmem [resolvable:$true] %s14_s7 }
   0x3   :  { %p46_p1 = scmp.lt.u32.totalorder %s42_s10, %s126_s0 }
   0x5   :  { %p48_p2 = pnand %p46_p1, %p43_p0 }
   0x7   :  { %51 = shalt.err (!%p48_p2)
}
   0x8   :  { %s52_s15 = scalar_lea.vmem %s15_s7, 256  ;;  %p57_p4 = scmp.lt.s32.totalorder %s15_s7, %s15_s7 }
   0x9   :  { %p53_p3 = scmp.ne.s32.totalorder %s15_s7, %s52_s15  ;;  %p58_p5 = scmp.lt.s32.totalorder %s52_s15, %s52_s15 }
   0xb   :  { %p59_p6 = por %p58_p5, %p57_p4 }
   0xd   :  { %p60_p7 = pnand %p59_p6, %p53_p3 }
   0xf   :  { %63 = shalt.err (!%p60_p7)
}
  0x10   :  { %17 = dma.hbm_to_vmem [thread:$0]  %s126_s0, 256, %s15_s7, [#allocation3]  }
  0x11   :  { %86 = dma.done.wait [#allocation3], 256  }
  0x12   :  { %87 = vsyncadd [#allocation3], 4294967040  ;;  %s91_s18 = smov [#allocation5]   ;;  %v21_v0 = vld [vmem:[#allocation2] sm:$0xff]  ;;  %v22_v1 = vld [vmem:[#allocation2 + $0x8] sm:$0xff] }
  0x13   :  { %s31_s19 = sshll.u32 %s91_s18, 4  ;;  %v23_v2 = vmax.f32 %v21_v0, %v22_v1  ;;  %s32_s19 = int_to_ptr.vmem [resolvable:$true] %s31_s19 }
  0x14   :  { %s64_s20 = scalar_lea.vmem %s32_s19, 128  ;;  %p69_p9 = scmp.lt.s32.totalorder %s32_s19, %s32_s19 }
  0x15   :  { %24 = vst [vmem:[#allocation5] sm:$0xff] %v23_v2  ;;  %p65_p8 = scmp.ne.s32.totalorder %s32_s19, %s64_s20  ;;  %p70_p10 = scmp.lt.s32.totalorder %s64_s20, %s64_s20 }
  0x17   :  { %p71_p11 = por %p70_p10, %p69_p9 }
  0x19   :  { %p72_p12 = pnand %p71_p11, %p65_p8 }
  0x1b   :  { %75 = shalt.err (!%p72_p12)
}
  0x1c   :  { %s76_s0 = scalar_lea.hbm %s127_s1, 128 }
  0x1d   :  { %p77_p13 = scmp.ne.s32.totalorder %s127_s1, %s76_s0  ;;  %p80_p0 = scmp.lt.u32.totalorder %s76_s0, %s127_s1 }
  0x1f   :  { %p82_p1 = pnand %p80_p0, %p77_p13 }
  0x21   :  { %85 = shalt.err (!%p82_p1)
}
  0x22   :  { %34 = dma.vmem_to_hbm [thread:$0]  %s32_s19, 128, %s127_s1, [#allocation4]  }
  0x23   :  { %88 = dma.done.wait [#allocation4], 128  }
  0x24   :  { %89 = vsyncadd [#allocation4], 4294967168 }
  0x25   :  { %38 = vsyncpa [#allocation3], 1 }
  0x26   :  { %39 = vsyncpa [#allocation4], 1 }

</bundles_post_ra>
